<compile_context>
chip_gen: v7x
topology: tpu7x:2x2x1
jax: 0.10.0
libtpu: 0.0.40
codegen_flags: <defaults>
</compile_context>

<pallas_src>
from functools import partial

import jax
import jax.numpy as jnp
from jax.experimental import pallas as pl
from jax.experimental.pallas import tpu as pltpu

EPS = 1e-5
LANE = 128


def decoder_kernel(x_ref, w1_ref, gb1_ref, w2_ref, gb2_ref, o_ref, acc_ref):
    k = pl.program_id(0)

    @pl.when(k == 0)
    def _():
        acc_ref[...] = jnp.zeros_like(acc_ref)

    # ---- Linear 1 (this H-block) on the MXU: bf16 operands, f32 accumulation.
    # Bias omitted (exactly cancelled by the following train-mode BN).
    x = x_ref[...].astype(jnp.bfloat16)                            # cast hides under MXU
    h = jnp.dot(x, w1_ref[...], preferred_element_type=jnp.float32)  # (B, tH) f32

    # ---- BatchNorm1d over this H-block (per-feature stats over the full batch -> exact).
    # One-pass variance: mean(h*h) - mu*mu, clamped at 0 (catastrophic cancellation).
    mu1 = jnp.mean(h, axis=0, keepdims=True)
    var1 = jnp.maximum(jnp.mean(h * h, axis=0, keepdims=True) - mu1 * mu1, 0.0)
    s1 = gb1_ref[0:1, :] * jax.lax.rsqrt(var1 + EPS)               # gamma * rsqrt(var+eps)
    t1 = gb1_ref[1:2, :] - mu1 * s1                                # beta  - mu * s
    # ---- Sigmoid (EUP); dropout = identity (see TODO at top) ----
    h = jax.nn.sigmoid(h * s1 + t1)

    # ---- Linear 2 partial product, accumulated in f32 VMEM scratch ----
    acc_ref[...] += jnp.dot(h.astype(jnp.bfloat16), w2_ref[...],
                            preferred_element_type=jnp.float32)    # (B, O_pad) f32

    @pl.when(k == pl.num_programs(0) - 1)
    def _():
        # ---- BatchNorm1d(O_pad), train-mode batch stats, folded to one scale+shift.
        # Pad columns of w2 are exactly zero -> o pad cols are 0, mu=var=0, output stays 0.
        o = acc_ref[...]
        mu2 = jnp.mean(o, axis=0, keepdims=True)
        var2 = jnp.maximum(jnp.mean(o * o, axis=0, keepdims=True) - mu2 * mu2, 0.0)
        s2 = gb2_ref[0:1, :] * jax.lax.rsqrt(var2 + EPS)
        t2 = gb2_ref[1:2, :] - mu2 * s2
        o_ref[...] = o * s2 + t2


def _pick_block_h(H):
    """tH: multiple of 256 when possible (fills the v6e/v7x 2x256x256 MXU), else 128."""
    for t in (512, 256, 128):
        if H % t == 0:
            return t
    return H


@partial(jax.jit, static_argnames=("out_dim", "block_h"))
def decoder_forward(x, w1, gb1, w2, gb2, *, out_dim, block_h=None):
    """x: (B, D) f32.  w1/w2: bf16 weights (w2 column-padded to a 128 multiple).
    gb1/gb2: packed (gamma; beta) f32 of shape (2, H) / (2, O_pad).  Returns (B, out_dim) f32."""
    B, D = x.shape
    H = w1.shape[1]
    o_pad = w2.shape[1]
    if block_h is None:
        block_h = _pick_block_h(H)
    assert H % block_h == 0, (H, block_h)
    n_blk = H // block_h

    out = pl.pallas_call(
        decoder_kernel,
        out_shape=jax.ShapeDtypeStruct((B, o_pad), jnp.float32),
        grid_spec=pltpu.PrefetchScalarGridSpec(
            num_scalar_prefetch=0,
            grid=(n_blk,),
            in_specs=[
                pl.BlockSpec((B, D), lambda k: (0, 0)),          # x: resident across grid
                pl.BlockSpec((D, block_h), lambda k: (0, k)),    # w1 H-block (double-buffered)
                pl.BlockSpec((2, block_h), lambda k: (0, k)),    # (gamma1; beta1) H-block
                pl.BlockSpec((block_h, o_pad), lambda k: (k, 0)),  # w2 H-block
                pl.BlockSpec((2, o_pad), lambda k: (0, 0)),      # (gamma2; beta2)
            ],
            out_specs=pl.BlockSpec((B, o_pad), lambda k: (0, 0)),
            scratch_shapes=[pltpu.VMEM((B, o_pad), jnp.float32)],  # linear2 accumulator
        ),
        compiler_params=pltpu.CompilerParams(
            dimension_semantics=("arbitrary",)),  # H is the linear2 reduction axis
    )(x, w1, gb1, w2, gb2)
    # Slice off the lane-padding.  (A consumer that can handle the padded slab could skip this.)
    return out[:, :out_dim]


def prepare_params(params):
    """Convert PyTorch-style params into the kernel's packed/padded/bf16 form.

    Drops b1/b2 (exactly cancelled by the following train-mode BatchNorm), packs each
    (gamma, beta) pair into one (2, F) array, pads the output feature dim to a multiple
    of 128 for lane-dense stores (pad cols of w2 are exactly zero), and casts the matmul
    weights to bf16.
    """
    w1, b1, g1, be1, w2, b2, g2, be2 = params
    del b1, b2  # cancelled by BN: (xW+b) - mean(xW+b) == xW - mean(xW)
    H = w1.shape[1]
    O = w2.shape[1]
    o_pad = ((O + LANE - 1) // LANE) * LANE

    gb1 = jnp.concatenate([g1, be1], axis=0).astype(jnp.float32)            # (2, H)
    w2p = jnp.zeros((H, o_pad), jnp.float32).at[:, :O].set(w2)
    g2p = jnp.ones((1, o_pad), jnp.float32).at[:, :O].set(g2)               # pad gamma=1
    be2p = jnp.zeros((1, o_pad), jnp.float32).at[:, :O].set(be2)            # pad beta=0
    gb2 = jnp.concatenate([g2p, be2p], axis=0).astype(jnp.float32)          # (2, O_pad)

    return (w1.astype(jnp.bfloat16), gb1, w2p.astype(jnp.bfloat16), gb2)


def init_params(key, input_dim, output_dim):
    """Deterministic PyTorch-style init (Linear: U(-1/sqrt(fan_in), 1/sqrt(fan_in)))."""
    hidden = input_dim * 4
    ks = jax.random.split(key, 8)
    lim1 = 1.0 / jnp.sqrt(jnp.float32(input_dim))
    w1 = jax.random.uniform(ks[0], (input_dim, hidden), jnp.float32, -lim1, lim1)
    b1 = jax.random.uniform(ks[1], (1, hidden), jnp.float32, -lim1, lim1)
    lim2 = 1.0 / jnp.sqrt(jnp.float32(hidden))
    w2 = jax.random.uniform(ks[2], (hidden, output_dim), jnp.float32, -lim2, lim2)
    b2 = jax.random.uniform(ks[3], (1, output_dim), jnp.float32, -lim2, lim2)
    # BN affine params: gamma=1, beta=0 with a deterministic perturbation so the affine
    # path is actually exercised.
    g1 = 1.0 + 0.1 * jax.random.normal(ks[4], (1, hidden), jnp.float32)
    be1 = 0.1 * jax.random.normal(ks[5], (1, hidden), jnp.float32)
    g2 = 1.0 + 0.1 * jax.random.normal(ks[6], (1, output_dim), jnp.float32)
    be2 = 0.1 * jax.random.normal(ks[7], (1, output_dim), jnp.float32)
    return (w1, b1, g1, be1, w2, b2, g2, be2)


def reference_f32(x, params):
    """Pure-JAX f32 reference mirroring the PyTorch forward exactly
    (train-mode BN, Linear biases included, dropout = identity)."""
    w1, b1, g1, be1, w2, b2, g2, be2 = params
    h = x @ w1 + b1
    mu = h.mean(0, keepdims=True)
    var = ((h - mu) ** 2).mean(0, keepdims=True)
    h = jax.nn.sigmoid((h - mu) / jnp.sqrt(var + EPS) * g1 + be1)
    o = h @ w2 + b2
    mu2 = o.mean(0, keepdims=True)
    var2 = ((o - mu2) ** 2).mean(0, keepdims=True)
    return (o - mu2) / jnp.sqrt(var2 + EPS) * g2 + be2


def reference_matched(x, params):
    """Pure-JAX reference mirroring the kernel's numerics (bf16 matmul operands,
    f32 accumulation, bias dropped, BN folded to scale/shift) for a tight check."""
    w1, _b1, g1, be1, w2, _b2, g2, be2 = params
    h = jnp.dot(x.astype(jnp.bfloat16), w1.astype(jnp.bfloat16),
                preferred_element_type=jnp.float32)
    mu = h.mean(0, keepdims=True)
    var = ((h - mu) ** 2).mean(0, keepdims=True)
    s1 = g1 * jax.lax.rsqrt(var + EPS)
    t1 = be1 - mu * s1
    h = jax.nn.sigmoid(h * s1 + t1)
    o = jnp.dot(h.astype(jnp.bfloat16), w2.astype(jnp.bfloat16),
                preferred_element_type=jnp.float32)
    mu2 = o.mean(0, keepdims=True)
    var2 = ((o - mu2) ** 2).mean(0, keepdims=True)
    s2 = g2 * jax.lax.rsqrt(var2 + EPS)
    t2 = be2 - mu2 * s2
    return o * s2 + t2


if __name__ == "__main__":
    # Small shapes consistent with the module: batch=32, input_dim=64 (hidden=256),
    # output_dim=100 (module default -> exercises the 128-lane padding path).
    B, D, O = 32, 64, 100
    key = jax.random.PRNGKey(0)
    k_x, k_p = jax.random.split(key)
    x = jax.random.normal(k_x, (B, D), jnp.float32)
    params = init_params(k_p, D, O)

    w1k, gb1, w2k, gb2 = prepare_params(params)
    # block_h=128 forces a 2-step grid here, exercising the accumulator init/finalize path.
    out = decoder_forward(x, w1k, gb1, w2k, gb2, out_dim=O, block_h=128)
    out = jax.block_until_ready(out)
    assert out.shape == (B, O), out.shape

    # Also run with auto tile selection (single grid step at this size).
    out_auto = jax.block_until_ready(
        decoder_forward(x, w1k, gb1, w2k, gb2, out_dim=O))
    assert jnp.allclose(out, out_auto, atol=2e-3, rtol=2e-3)

    # Tight check against a reference with identical numerics (bf16 matmuls, fused BN).
    ref_same = reference_matched(x, params)
    err_same = float(jnp.max(jnp.abs(out - ref_same)))
    assert jnp.allclose(out, ref_same, atol=2e-3, rtol=2e-3), err_same

    # Loose sanity check against the full-precision PyTorch-semantics reference
    # (includes the Linear biases -> also verifies the BN bias-cancellation).
    ref_f32 = reference_f32(x, params)
    err_f32 = float(jnp.max(jnp.abs(out - ref_f32)))
    assert jnp.allclose(out, ref_f32, atol=1e-1, rtol=1e-1), err_f32

    print("KERNEL_OK")
</pallas_src>

<mosaic_0001>
module attributes {stable_mosaic.version = 11 : i64} {
  func.func @decoder_kernel(%arg0: i32, %arg1: memref<32x64xf32, #tpu.memory_space<vmem>>, %arg2: memref<64x128xbf16, #tpu.memory_space<vmem>>, %arg3: memref<2x128xf32, #tpu.memory_space<vmem>>, %arg4: memref<128x128xbf16, #tpu.memory_space<vmem>>, %arg5: memref<2x128xf32, #tpu.memory_space<vmem>>, %arg6: memref<32x128xf32, #tpu.memory_space<vmem>>, %arg7: memref<32x128xf32, #tpu.memory_space<vmem>>) attributes {dimension_semantics = [#tpu.dimension_semantics<arbitrary>], iteration_bounds = array<i64: 2>, scalar_prefetch = 0 : i64, scratch_operands = 1 : i64, tpu.core_type = #tpu.core_type<tc>, window_params = [{pipeline_mode = #tpu.pipeline_mode<synchronous>, transform_indices = @transform_0, window_bounds = array<i64: 32, 64>}, {transform_indices = @transform_1, window_bounds = array<i64: 64, 128>}, {transform_indices = @transform_2, window_bounds = array<i64: 2, 128>}, {transform_indices = @transform_3, window_bounds = array<i64: 128, 128>}, {pipeline_mode = #tpu.pipeline_mode<synchronous>, transform_indices = @transform_4, window_bounds = array<i64: 2, 128>}, {pipeline_mode = #tpu.pipeline_mode<synchronous>, transform_indices = @transform_5, window_bounds = array<i64: 32, 128>}]} {
    %c0_i32 = arith.constant 0 : i32
    %0 = arith.cmpi eq, %arg0, %c0_i32 : i32
    %1 = arith.extui %0 : i1 to i32
    %c0_i32_0 = arith.constant 0 : i32
    %2 = arith.cmpi ne, %1, %c0_i32_0 : i32
    scf.if %2 {
      %cst_22 = arith.constant 0.000000e+00 : f32
      %46 = vector.broadcast %cst_22 : f32 to vector<32x128xf32>
      %c0_23 = arith.constant 0 : index
      %c0_24 = arith.constant 0 : index
      %47 = vector.load %arg7[%c0_23, %c0_24] : memref<32x128xf32, #tpu.memory_space<vmem>>, vector<32x128xf32>
      tpu.vector_store %arg7[%c0_23, %c0_24], %46 {strides = array<i32>} : memref<32x128xf32, #tpu.memory_space<vmem>>, vector<32x128xf32>,
    } else {
    }
    %c0 = arith.constant 0 : index
    %c0_1 = arith.constant 0 : index
    %3 = vector.load %arg1[%c0, %c0_1] : memref<32x64xf32, #tpu.memory_space<vmem>>, vector<32x64xf32>
    %4 = arith.truncf %3 : vector<32x64xf32> to vector<32x64xbf16>
    %c0_2 = arith.constant 0 : index
    %c0_3 = arith.constant 0 : index
    %5 = vector.load %arg2[%c0_2, %c0_3] : memref<64x128xbf16, #tpu.memory_space<vmem>>, vector<64x128xbf16>
    %cst = arith.constant dense<0.000000e+00> : vector<32x128xf32>
    %6 = tpu.matmul %4, %5, %cst {dimension_numbers = #tpu.dot_dimension_numbers<[1], [0], [0], [1], [0, 0, 1, 1], [], []>} : vector<32x64xbf16>, vector<64x128xbf16>, vector<32x128xf32> -> vector<32x128xf32>
    %cst_4 = arith.constant dense<0.000000e+00> : vector<128xf32>
    %7 = vector.multi_reduction <add>, %6, %cst_4 [0] : vector<32x128xf32> to vector<128xf32>
    %8 = vector.shape_cast %7 : vector<128xf32> to vector<1x128xf32>
    %cst_5 = arith.constant 3.200000e+01 : f32
    %9 = vector.broadcast %cst_5 : f32 to vector<1x128xf32>
    %10 = arith.divf %8, %9 : vector<1x128xf32>
    %11 = arith.mulf %6, %6 : vector<32x128xf32>
    %cst_6 = arith.constant dense<0.000000e+00> : vector<128xf32>
    %12 = vector.multi_reduction <add>, %11, %cst_6 [0] : vector<32x128xf32> to vector<128xf32>
    %13 = vector.shape_cast %12 : vector<128xf32> to vector<1x128xf32>
    %cst_7 = arith.constant 3.200000e+01 : f32
    %14 = vector.broadcast %cst_7 : f32 to vector<1x128xf32>
    %15 = arith.divf %13, %14 : vector<1x128xf32>
    %16 = arith.mulf %10, %10 : vector<1x128xf32>
    %17 = arith.subf %15, %16 : vector<1x128xf32>
    %cst_8 = arith.constant 0.000000e+00 : f32
    %18 = vector.broadcast %cst_8 : f32 to vector<1x128xf32>
    %19 = arith.maximumf %17, %18 : vector<1x128xf32>
    %c0_9 = arith.constant 0 : index
    %c0_10 = arith.constant 0 : index
    %20 = vector.load %arg3[%c0_9, %c0_10] : memref<2x128xf32, #tpu.memory_space<vmem>>, vector<1x128xf32>
    %cst_11 = arith.constant 9.99999974E-6 : f32
    %21 = vector.broadcast %cst_11 : f32 to vector<1x128xf32>
    %22 = arith.addf %19, %21 : vector<1x128xf32>
    %23 = math.rsqrt %22 : vector<1x128xf32>
    %24 = arith.mulf %20, %23 : vector<1x128xf32>
    %c1 = arith.constant 1 : index
    %c0_12 = arith.constant 0 : index
    %25 = vector.load %arg3[%c1, %c0_12] : memref<2x128xf32, #tpu.memory_space<vmem>>, vector<1x128xf32>
    %26 = arith.mulf %10, %24 : vector<1x128xf32>
    %27 = arith.subf %25, %26 : vector<1x128xf32>
    %28 = vector.broadcast %24 : vector<1x128xf32> to vector<32x128xf32>
    %29 = arith.mulf %6, %28 : vector<32x128xf32>
    %30 = vector.broadcast %27 : vector<1x128xf32> to vector<32x128xf32>
    %31 = arith.addf %29, %30 : vector<32x128xf32>
    %32 = arith.negf %31 : vector<32x128xf32>
    %33 = math.exp %32 : vector<32x128xf32>
    %cst_13 = arith.constant 1.000000e+00 : f32
    %34 = vector.broadcast %cst_13 : f32 to vector<32x128xf32>
    %35 = arith.addf %34, %33 : vector<32x128xf32>
    %36 = arith.divf %34, %35 : vector<32x128xf32>
    %c0_14 = arith.constant 0 : index
    %c0_15 = arith.constant 0 : index
    %37 = vector.load %arg7[%c0_14, %c0_15] : memref<32x128xf32, #tpu.memory_space<vmem>>, vector<32x128xf32>
    %38 = arith.truncf %36 : vector<32x128xf32> to vector<32x128xbf16>
    %c0_16 = arith.constant 0 : index
    %c0_17 = arith.constant 0 : index
    %39 = vector.load %arg4[%c0_16, %c0_17] : memref<128x128xbf16, #tpu.memory_space<vmem>>, vector<128x128xbf16>
    %cst_18 = arith.constant dense<0.000000e+00> : vector<32x128xf32>
    %40 = tpu.matmul %38, %39, %cst_18 {dimension_numbers = #tpu.dot_dimension_numbers<[1], [0], [0], [1], [0, 0, 1, 1], [], []>} : vector<32x128xbf16>, vector<128x128xbf16>, vector<32x128xf32> -> vector<32x128xf32>
    %41 = arith.addf %37, %40 : vector<32x128xf32>
    %c0_19 = arith.constant 0 : index
    %c0_20 = arith.constant 0 : index
    %42 = vector.load %arg7[%c0_19, %c0_20] : memref<32x128xf32, #tpu.memory_space<vmem>>, vector<32x128xf32>
    tpu.vector_store %arg7[%c0_19, %c0_20], %41 {strides = array<i32>} : memref<32x128xf32, #tpu.memory_space<vmem>>, vector<32x128xf32>,
    %c1_i32 = arith.constant 1 : i32
    %43 = arith.cmpi eq, %arg0, %c1_i32 : i32
    %44 = arith.extui %43 : i1 to i32
    %c0_i32_21 = arith.constant 0 : i32
    %45 = arith.cmpi ne, %44, %c0_i32_21 : i32
    scf.if %45 {
      %c0_22 = arith.constant 0 : index
      %c0_23 = arith.constant 0 : index
      %46 = vector.load %arg7[%c0_22, %c0_23] : memref<32x128xf32, #tpu.memory_space<vmem>>, vector<32x128xf32>
      %cst_24 = arith.constant dense<0.000000e+00> : vector<128xf32>
      %47 = vector.multi_reduction <add>, %46, %cst_24 [0] : vector<32x128xf32> to vector<128xf32>
      %48 = vector.shape_cast %47 : vector<128xf32> to vector<1x128xf32>
      %cst_25 = arith.constant 3.200000e+01 : f32
      %49 = vector.broadcast %cst_25 : f32 to vector<1x128xf32>
      %50 = arith.divf %48, %49 : vector<1x128xf32>
      %51 = arith.mulf %46, %46 : vector<32x128xf32>
      %cst_26 = arith.constant dense<0.000000e+00> : vector<128xf32>
      %52 = vector.multi_reduction <add>, %51, %cst_26 [0] : vector<32x128xf32> to vector<128xf32>
      %53 = vector.shape_cast %52 : vector<128xf32> to vector<1x128xf32>
      %cst_27 = arith.constant 3.200000e+01 : f32
      %54 = vector.broadcast %cst_27 : f32 to vector<1x128xf32>
      %55 = arith.divf %53, %54 : vector<1x128xf32>
      %56 = arith.mulf %50, %50 : vector<1x128xf32>
      %57 = arith.subf %55, %56 : vector<1x128xf32>
      %cst_28 = arith.constant 0.000000e+00 : f32
      %58 = vector.broadcast %cst_28 : f32 to vector<1x128xf32>
      %59 = arith.maximumf %57, %58 : vector<1x128xf32>
      %c0_29 = arith.constant 0 : index
      %c0_30 = arith.constant 0 : index
      %60 = vector.load %arg5[%c0_29, %c0_30] : memref<2x128xf32, #tpu.memory_space<vmem>>, vector<1x128xf32>
      %cst_31 = arith.constant 9.99999974E-6 : f32
      %61 = vector.broadcast %cst_31 : f32 to vector<1x128xf32>
      %62 = arith.addf %59, %61 : vector<1x128xf32>
      %63 = math.rsqrt %62 : vector<1x128xf32>
      %64 = arith.mulf %60, %63 : vector<1x128xf32>
      %c1_32 = arith.constant 1 : index
      %c0_33 = arith.constant 0 : index
      %65 = vector.load %arg5[%c1_32, %c0_33] : memref<2x128xf32, #tpu.memory_space<vmem>>, vector<1x128xf32>
      %66 = arith.mulf %50, %64 : vector<1x128xf32>
      %67 = arith.subf %65, %66 : vector<1x128xf32>
      %68 = vector.broadcast %64 : vector<1x128xf32> to vector<32x128xf32>
      %69 = arith.mulf %46, %68 : vector<32x128xf32>
      %70 = vector.broadcast %67 : vector<1x128xf32> to vector<32x128xf32>
      %71 = arith.addf %69, %70 : vector<32x128xf32>
      %c0_34 = arith.constant 0 : index
      %c0_35 = arith.constant 0 : index
      %72 = vector.load %arg6[%c0_34, %c0_35] : memref<32x128xf32, #tpu.memory_space<vmem>>, vector<32x128xf32>
      tpu.vector_store %arg6[%c0_34, %c0_35], %71 {strides = array<i32>} : memref<32x128xf32, #tpu.memory_space<vmem>>, vector<32x128xf32>,
    } else {
    }
    return
  }
  func.func @transform_0(%arg0: i32) -> (i32, i32) {
    %c0_i32 = arith.constant 0 : i32
    %c0_i32_0 = arith.constant 0 : i32
    %c0_i32_1 = arith.constant 0 : i32
    return %c0_i32, %c0_i32_0 : i32, i32
  }
  func.func @transform_1(%arg0: i32) -> (i32, i32) {
    %c0_i32 = arith.constant 0 : i32
    %c0_i32_0 = arith.constant 0 : i32
    return %c0_i32, %arg0 : i32, i32
  }
  func.func @transform_2(%arg0: i32) -> (i32, i32) {
    %c0_i32 = arith.constant 0 : i32
    %c0_i32_0 = arith.constant 0 : i32
    return %c0_i32, %arg0 : i32, i32
  }
  func.func @transform_3(%arg0: i32) -> (i32, i32) {
    %c0_i32 = arith.constant 0 : i32
    %c0_i32_0 = arith.constant 0 : i32
    return %arg0, %c0_i32 : i32, i32
  }
  func.func @transform_4(%arg0: i32) -> (i32, i32) {
    %c0_i32 = arith.constant 0 : i32
    %c0_i32_0 = arith.constant 0 : i32
    %c0_i32_1 = arith.constant 0 : i32
    return %c0_i32, %c0_i32_0 : i32, i32
  }
  func.func @transform_5(%arg0: i32) -> (i32, i32) {
    %c0_i32 = arith.constant 0 : i32
    %c0_i32_0 = arith.constant 0 : i32
    %c0_i32_1 = arith.constant 0 : i32
    return %c0_i32, %c0_i32_0 : i32, i32
  }
}

</mosaic_0001>

<bundles_post_ra>
// kernel: decoder_forward.1
= control target key start
LH: loop header
LB: loop body
LE: loop exit
PB: predicated region body
PF: predicated region fallthrough
CT: control target
= control target key end

     0   :  { %10 = vsyncpa [#allocation4], 0  ;;  %s1408_s0 = inlined_call_operand.hbm [shape: f32[32,64], index: 0, kind: input, shape index: {}]   ;;  %s1409_s1 = inlined_call_operand.hbm [shape: bf16[64,256], index: 1, kind: input, shape index: {}]   ;;  %s1410_s2 = inlined_call_operand.vmem [shape: f32[2,256], index: 2, kind: input, shape index: {}]   ;;  %s1411_s3 = inlined_call_operand.hbm [shape: bf16[256,128], index: 3, kind: input, shape index: {}]   ;;  %s1412_s4 = inlined_call_operand.vmem [shape: f32[2,128], index: 4, kind: input, shape index: {}]   ;;  %s1413_s5 = inlined_call_operand.hbm [shape: f32[32,128], index: 5, kind: output, shape index: {}]  }
   0x1   :  { %11 = vsyncpa [#allocation7], 0 }
   0x2   :  { %13 = vsyncpa [#allocation7 + $0x1], 0 }
   0x3   :  { %14 = vsyncpa [#allocation5], 0  ;;  %s1157_s18 = smov 0   ;;  %s1159_s19 = smov 0  }
   0x4   :  { %s1161_s20 = smov 0   ;;  %s1163_s21 = smov 0  }
   0x5 LB: > { %s1178_s22 = sadd.s32 1, %s1114_s21   ;;  %s48_s23 = sadd.s32 1, %s1110_s20  ;;  %s1114_s21 = sphi %s1163_s21, %s1437_s21   ;;  %s1110_s20 = sphi %s1161_s20, %s1436_s20   ;;  %s1106_s19 = sphi %s1159_s19, %s1435_s19   ;;  %s1102_s18 = sphi %s1157_s18, %s1434_s18  }
   0x6   : > { %s45_s24 = ssub.s32 %s1114_s21, %s1178_s22  ;;  %p55_p0 = scmp.ne.s32.totalorder %s1110_s20, %s1106_s19 }
   0x7   : > { %p46_p1 = scmp.eq.s32.totalorder %s45_s24, 0  ;;  %p56_p2 = scmp.eq.s32.totalorder %s1114_s21, 0 }
   0x8   : > { %p881_p4 = scmp.lt.s32.totalorder %s1114_s21, 2  ;;  %s195_s26 = sand.u32 1, %s1114_s21  }
   0x9   : > { %s1187_s25 = scalar_select %p46_p1, %s1110_s20, %s48_s23  }
   0xa   : > { %p57_p3 = por %p56_p2, %p55_p0  ;;  %s197_s27 = sand.u32 1, %s1110_s20  }
   0xb   : > { %s774_s28 = sshll.u32 %s197_s27, 5  ;;  %s775_s29 = sshll.u32 %s1114_s21, 6 }
   0xc   : > { %s1198_s7 = scalar_lea.hbm %s1409_s1, %s775_s29  ;;  %s199_s8 = scalar_lea.vmem [#allocation6], %s774_s28 }
   0xd   : > { %s205_s9 = sshll.u32 %s199_s8, 4  ;;  %p1202_p5 = pnand %p881_p4, %p57_p3  ;;  %s1200_s9 = int_to_ptr.vmem [resolvable:$true] %s205_s9 }
   0xe   : > { %s1206_s11 = scalar_lea.sflag [#allocation7], %s195_s26  ;;  %s958_s12 = scalar_lea.hbm %s1198_s7, 512 }
   0xf   : > { %s1421_s10 = scalar_select %p1202_p5, 1, 0 }
  0x10   : > { %p959_p6 = scmp.ne.s32.totalorder %s1198_s7, %s958_s12  ;;  %p1416_p7 = pneg %p1202_p5 }
  0x11   : > { %s963_s15 = scalar_lea.hbm %s1409_s1, 1024  ;;  %p964_p10 = scmp.lt.u32.totalorder %s1198_s7, %s1409_s1 }
  0x12   : > { %p961_p8 = pnand %p1416_p7, %p959_p6  ;;  %p965_p11 = scmp.lt.u32.totalorder %s963_s15, %s958_s12 }
  0x13   : > { %p967_p13 = scmp.lt.u32.totalorder %s958_s12, %s1198_s7 }
  0x14   : > { %p962_p9 = pneg %p961_p8  ;;  %p966_p12 = por %p965_p11, %p964_p10 }
  0x16   : > { %p968_p0 = por %p967_p13, %p966_p12 }
  0x18   : > { %p969_p1 = pnand %p968_p0, %p962_p9 }
  0x1a   : > { %972 = shalt.err (!%p969_p1)
}
  0x1b   : > { %s973_s23 = scalar_lea.vmem %s1200_s9, 512  ;;  %s1116_s24 = smov [#allocation6]  }
  0x1c   : > { %p974_p2 = scmp.ne.s32.totalorder %s1200_s9, %s973_s23  ;;  %s978_s26 = sshll.u32 %s1116_s24, 4  ;;  %s979_s26 = int_to_ptr.vmem [resolvable:$false] %s978_s26 }
  0x1d   : > { %s980_s28 = scalar_lea.vmem %s979_s26, 1024  ;;  %p981_p6 = scmp.lt.s32.totalorder %s1200_s9, %s979_s26 }
  0x1e   : > { %p976_p3 = pnand %p974_p2, %p1416_p7  ;;  %p982_p8 = scmp.lt.s32.totalorder %s980_s28, %s973_s23 }
  0x20   : > { %p977_p4 = pneg %p976_p3  ;;  %p983_p10 = por %p982_p8, %p981_p6 }
  0x22   : > { %p984_p11 = pnand %p983_p10, %p977_p4 }
  0x24   : > { %987 = shalt.err (!%p984_p11)
}
  0x25   : > { %s1117_s29 = smov 128   ;;  %s1414_s30 = smov 64  }
  0x26   : > { %s1119_s6 = smov 4   ;;  %s1238_s8 = sadd.s32 4294967295, %s1114_s21  }
  0x27   : > { %876 = dma.hbm_to_vmem [thread:$0]  (!%p1202_p5), %s1198_s7, 512, %s1200_s9, %s1206_s11, %s1117_s29, %s1414_s30, %s1119_s6  }
  0x28   : > { %p61_p9 = scmp.ne.s32.totalorder %s1106_s19, %s1102_s18  ;;  %p1415_p12 = scmp.eq.s32.totalorder %s1238_s8, 0 }
  0x29   : > { %p771_p13 = scmp.ge.s32.totalorder %s1114_s21, 1  ;;  %p166_p0 = scmp.lt.s32.totalorder %s1114_s21, 3 }
  0x2a   : > { %p1247_p1 = por %p1415_p12, %p61_p9  ;;  %s1120_s7 = smov [#allocation3]  }
  0x2b   : > { %p1252_p3 = pnand %p771_p13, %p166_p0  ;;  %s178_s9 = sshll.u32 %s1120_s7, 4  ;;  %s1258_s9 = int_to_ptr.vmem [resolvable:$true] %s178_s9 }
  0x2c   : > { %s1422_s12 = scalar_select %p1247_p1, 1, 0 }
  0x2d   : > { %s1423_s13 = scalar_select %p1252_p3, 1, 0 }
  0x2e   : > { %p869_p4 = pneg %p1252_p3  ;;  %s776_s18 = sshll.u32 %s197_s27, 6 }
  0x2f   : > { %s808_s14 = sshll.u32 %s1114_s21, 10  ;;  %s226_s24 = scalar_lea.vmem [#allocation8], %s776_s18 }
  0x30   : > { %p1265_p6 = pnand %p869_p4, %p1415_p12  ;;  %s1272_s23 = scalar_lea.hbm %s1411_s3, %s808_s14 }
  0x31   : > { %s233_s26 = sshll.u32 %s226_s24, 4  ;;  %s988_s27 = scalar_lea.hbm %s1408_s0, 512  ;;  %s1274_s26 = int_to_ptr.vmem [resolvable:$true] %s233_s26 }
  0x32   : > { %p989_p8 = scmp.ne.s32.totalorder %s1408_s0, %s988_s27  ;;  %p990_p10 = pneg %p1265_p6 }
  0x33   : > { %p995_p13 = scmp.lt.u32.totalorder %s988_s27, %s1408_s0 }
  0x34   : > { %p991_p11 = pnand %p990_p10, %p989_p8 }
  0x36   : > { %p992_p9 = pneg %p991_p11 }
  0x38   : > { %p997_p0 = pnand %p995_p13, %p992_p9 }
  0x3a   : > { %1000 = shalt.err (!%p997_p0)
}
  0x3b   : > { %s1001_s18 = scalar_lea.vmem %s1258_s9, 512  ;;  %p1009_p7 = scmp.lt.s32.totalorder %s1258_s9, %s1258_s9 }
  0x3c   : > { %p1002_p4 = scmp.ne.s32.totalorder %s1258_s9, %s1001_s18  ;;  %p1010_p1 = scmp.lt.s32.totalorder %s1001_s18, %s1001_s18 }
  0x3e   : > { %p1004_p2 = pnand %p1002_p4, %p990_p10  ;;  %p1011_p3 = por %p1010_p1, %p1009_p7 }
  0x40   : > { %p1005_p12 = pneg %p1004_p2 }
  0x42   : > { %p1012_p5 = pnand %p1011_p3, %p1005_p12 }
  0x44   : > { %1015 = shalt.err (!%p1012_p5)
}
  0x45   : > { %s1121_s30 = smov 8   ;;  %s1016_s28 = scalar_lea.hbm %s1272_s23, 1024 }
  0x46   : > { %872 = dma.hbm_to_vmem [thread:$0]  (!%p1265_p6), %s1408_s0, 512, %s1258_s9, [#allocation4], %s1117_s29, %s1117_s29, %s1121_s30  }
  0x47   : > { %p1017_p2 = scmp.ne.s32.totalorder %s1272_s23, %s1016_s28  ;;  %p1425_p7 = scmp.ne.s32.totalorder %s1421_s10, 0 }
  0x48   : > { %s1021_s27 = scalar_lea.hbm %s1411_s3, 2048  ;;  %p1022_p3 = scmp.lt.u32.totalorder %s1272_s23, %s1411_s3 }
  0x49   : > { %p1426_p12 = pneg %p1425_p7  ;;  %p1023_p8 = scmp.lt.u32.totalorder %s1021_s27, %s1016_s28 }
  0x4a   : > { %p1025_p11 = scmp.lt.u32.totalorder %s1016_s28, %s1272_s23 }
  0x4b   : > { %p1019_p5 = pnand %p1017_p2, %p1426_p12  ;;  %p1024_p10 = por %p1023_p8, %p1022_p3 }
  0x4d   : > { %p1020_p1 = pneg %p1019_p5  ;;  %p1026_p9 = por %p1025_p11, %p1024_p10 }
  0x4f   : > { %p1027_p13 = pnand %p1026_p9, %p1020_p1 }
  0x51   : > { %1030 = shalt.err (!%p1027_p13)
}
  0x52   : > { %s1031_s29 = scalar_lea.vmem %s1274_s26, 1024  ;;  %p1427_p0 = pmov %p1426_p12 }
  0x53   : > { %p1032_p6 = scmp.ne.s32.totalorder %s1274_s26, %s1031_s29  ;;  %s1122_s9 = smov [#allocation8]  }
  0x54   : > { %s1036_s17 = sshll.u32 %s1122_s9, 4  ;;  %s1037_s17 = int_to_ptr.vmem [resolvable:$false] %s1036_s17 }
  0x55   : > { %p1034_p4 = pnand %p1032_p6, %p1427_p0  ;;  %s1038_s18 = scalar_lea.vmem %s1037_s17, 2048 }
  0x56   : > { %p1039_p12 = scmp.lt.s32.totalorder %s1274_s26, %s1037_s17  ;;  %p1040_p5 = scmp.lt.s32.totalorder %s1038_s18, %s1031_s29 }
  0x57   : > { %p1035_p2 = pneg %p1034_p4 }
  0x58   : > { %p1041_p3 = por %p1040_p5, %p1039_p12 }
  0x5a   : > { %p1042_p8 = pnand %p1041_p3, %p1035_p2 }
  0x5c   : > { %1045 = shalt.err (!%p1042_p8)
}
  0x5d   : > { %s1428_s30 = smov 64   ;;  %p1429_p1 = scmp.ne.s32.totalorder %s1423_s13, 0 }
  0x5e   : > { %879 = dma.hbm_to_vmem [thread:$0]  (!%p1425_p7), %s1272_s23, 1024, %s1274_s26, %s1206_s11, %s1428_s30, %s1428_s30, %s1119_s6  }
  0x5f   : > { %245 = sbr.rel (%p1429_p1) target bundleno = 732 (0x2dc), region = 40  ;;  %p1430_p10 = scmp.eq.s32.totalorder (!%p1429_p1), %s1238_s8, 0 }
  0x66   : > { %1089 = dma.done.wait (%p1430_p10), [#allocation4], 512   ;;  %p1431_p11 = pmov %p1430_p10 }
  0x67   : > { %s251_s10 = sand.u32 1, %s1238_s8   ;;  %s253_s14 = sand.u32 1, %s1106_s19  }
  0x68   : > { %1091 = vsyncadd (%p1431_p11), [#allocation4], 4294966784  ;;  %s781_s24 = sshll.u32 %s253_s14, 5  ;;  %s252_s28 = scalar_lea.sflag [#allocation7], %s251_s10 }
  0x69   : > { %s255_s7 = scalar_lea.vmem [#allocation6], %s781_s24  ;;  %p1432_p9 = scmp.ne.s32.totalorder %s1422_s12, 0 }
  0x6b   : > { %1093 = dma.done.wait (%p1432_p9), %s252_s28, 1536  }
  0x6c   : > { %1095 = vsyncadd (%p1432_p9), %s252_s28, 4294965760  ;;  %s782_s11 = sshll.u32 %s253_s14, 6  ;;  %p295_p7 = scmp.lt.s32.totalorder %s1238_s8, 1 }
  0x6d   : > { %s1345_s27 = scalar_lea.vmem [#allocation8], %s782_s11  ;;  %p1433_p13 = scmp.ne.s32.totalorder %s1238_s8, 0 }
  0x6e   : > { %s296_s6 = scalar_select %p295_p7, %s1238_s8, 1 }
  0x6f   : > { %304 = sbr.rel (%p1433_p13) target bundleno = 118 (0x76), region = 56  ;;  %v1123_v0 = vmov (!%p1433_p13), 0.0  }
  0x70   : > { %s783_s13 = sshll.u32 %s296_s6, 1  ;;  %305 = vst [vmem:[#allocation2] sm:$0xff] (!%p1433_p13), %v1123_v0  ;;  %306 = vst [vmem:[#allocation2 + $0x8] sm:$0xff] (!%p1433_p13), %v1123_v0 }
  0x71   : > { %s1343_s15 = scalar_lea.vmem %s1410_s2, %s783_s13  ;;  %307 = vst [vmem:[#allocation2 + $0x10] sm:$0xff] (!%p1433_p13), %v1123_v0  ;;  %308 = vst [vmem:[#allocation2 + $0x18] sm:$0xff] (!%p1433_p13), %v1123_v0 }
  0x76 PF: > { %v926_v1 = vld [vmem:[%s255_s7] sm:$0xff]   ;;  %v927_v2 = vld [vmem:[%s255_s7 + $0x8] sm:$0xff]   ;;  %v928_v3 = vld [vmem:[%s255_s7 + $0x10] sm:$0xff]   ;;  %vm347_vm0 = vcmask 523264   ;;  %v438_v51 = vlaneseq  ;;  %p803_p6 = scmp.ne.s32.totalorder %s1238_s8, 1 }
  0x77   : > { %825 = vmatprep.subr.bf16.mxu0 %v926_v1  ;;  %v309_v4 = vld [vmem:[#allocation3] sm:$0xff]  ;;  %v310_v5 = vld [vmem:[#allocation3 + $0x8] sm:$0xff]  ;;  %v929_v7 = vld [vmem:[%s255_s7 + $0x18] sm:$0xff]  }
  0x78   : > { %826 = vmatpush3.bf16.msra.mxu0 %v926_v1  ;;  %v313_v6 = vpack.c.bf16 %v310_v5, %v309_v4  ;;  %v311_v8 = vld [vmem:[#allocation3 + $0x10] sm:$0xff]  ;;  %v312_v9 = vld [vmem:[#allocation3 + $0x18] sm:$0xff]  ;;  %v930_v11 = vld [vmem:[%s1345_s27] sm:$0xff]   ;;  %v439_v52 = vshrl.u32 %v438_v51, 7 }
  0x79   : > { %827 = vmatprep.subr.bf16.mxu0 %v927_v2  ;;  %v314_v10 = vpack.c.bf16 %v312_v9, %v311_v8  ;;  %837 = vmatprep.subr.bf16.mxu1 %v930_v11  ;;  %v931_v12 = vld [vmem:[%s1345_s27 + $0x8] sm:$0xff]   ;;  %v932_v13 = vld [vmem:[%s1345_s27 + $0x10] sm:$0xff]   ;;  %v933_v14 = vld [vmem:[%s1345_s27 + $0x18] sm:$0xff]  }
  0x7a   : > { %833 = vmatprep.mubr.msk.bf16.mxu0 %vm347_vm0, %v313_v6  ;;  %838 = vmatpush3.bf16.msra.mxu1 %v930_v11  ;;  %v934_v15 = vld [vmem:[%s1345_s27 + $0x20] sm:$0xff]   ;;  %v935_v16 = vld [vmem:[%s1345_s27 + $0x28] sm:$0xff]   ;;  %v936_v17 = vld [vmem:[%s1345_s27 + $0x30] sm:$0xff]   ;;  %v1358_v54 = vsub.s32 0, %v439_v52 }
  0x7b   : > { %839 = vmatprep.subr.bf16.mxu1 %v931_v12  ;;  %v937_v18 = vld [vmem:[%s1345_s27 + $0x38] sm:$0xff]   ;;  %v431_v53 = vld [vmem:[%s1343_s15] sm:$0x1]  ;;  %v435_v57 = vld [vmem:[%s1343_s15 + $0x1] sm:$0x1] }
  0x7c   : > { %828 = vmatpush3.bf16.msra.mxu0 %v927_v2 }
  0x7d   : > { %829 = vmatprep.subr.bf16.mxu0 %v928_v3 }
  0x7e   : > { %840 = vmatpush3.bf16.msra.mxu1 %v931_v12 }
  0x7f   : > { %841 = vmatprep.subr.bf16.mxu1 %v932_v13 }
  0x80   : > { %830 = vmatpush3.bf16.msra.mxu0 %v928_v3 }
  0x81   : > { %831 = vmatprep.subr.bf16.mxu0 %v929_v7 }
  0x82   : > { %842 = vmatpush3.bf16.msra.mxu1 %v932_v13 }
  0x83   : > { %843 = vmatprep.subr.bf16.mxu1 %v933_v14 }
  0x84   : > { %832 = vmatpush3.bf16.msra.mxu0 %v929_v7 }
  0x86   : > { %844 = vmatpush3.bf16.msra.mxu1 %v933_v14 }
  0x87   : > { %834 = vmatmul.mubr.msk.bf16.vlgmr.msra.gmra.mrb[0].mxu0 %vm347_vm0, %v314_v10  ;;  %845 = vmatprep.subr.bf16.mxu1 %v934_v15 }
  0x8a   : > { %846 = vmatpush3.bf16.msra.mxu1 %v934_v15 }
  0x8b   : > { %847 = vmatprep.subr.bf16.mxu1 %v935_v16 }
  0x8e   : > { %848 = vmatpush3.bf16.msra.mxu1 %v935_v16 }
  0x8f   : > { %849 = vmatprep.subr.bf16.mxu1 %v936_v17 }
  0x92   : > { %850 = vmatpush3.bf16.msra.mxu1 %v936_v17 }
  0x93   : > { %851 = vmatprep.subr.bf16.mxu1 %v937_v18 }
  0x96   : > { %852 = vmatpush3.bf16.msra.mxu1 %v937_v18 }
 0x15a   : > { %v835_v19 = vpop.f32.mrb[0].mxu0 }
 0x15b   : > { %v388_v20 = vpop.f32.mrb[1].mxu0  ;;  %v416_v26 = vmul.f32 %v835_v19, %v835_v19 }
 0x15c   : > { %v836_v21 = vpop.f32.mrb[2].mxu0  ;;  %v414_v23 = vmul.f32 %v388_v20, %v388_v20 }
 0x15d   : > { %v391_v22 = vpop.f32.mrb[3].mxu0  ;;  %v417_v29 = vmul.f32 %v836_v21, %v836_v21 }
 0x15e   : > { %v403_v24 = vadd.f32 %v391_v22, %v388_v20  ;;  %v415_v25 = vmul.f32 %v391_v22, %v391_v22 }
 0x160   : > { %v404_v27 = vadd.f32 %v835_v19, %v403_v24  ;;  %v418_v28 = vadd.f32 %v415_v25, %v414_v23  ;;  %v480_v24 = vld [vmem:[#allocation2 + $0x10] sm:$0xff]  ;;  %v478_v25 = vld [vmem:[#allocation2] sm:$0xff] }
 0x162   : > { %v405_v30 = vadd.f32 %v836_v21, %v404_v27  ;;  %v419_v31 = vadd.f32 %v418_v28, %v416_v26  ;;  %v481_v27 = vld [vmem:[#allocation2 + $0x18] sm:$0xff] }
 0x164   : > { %v406_v32 = vrot.slane %v405_v30, 4  ;;  %v420_v33 = vadd.f32 %v419_v31, %v417_v29 }
 0x166   : > { %v407_v34 = vadd.f32 %v406_v32, %v405_v30  ;;  %v421_v35 = vrot.slane %v420_v33, 4  ;;  %v479_v30 = vld [vmem:[#allocation2 + $0x8] sm:$0xff] }
 0x168   : > { %v408_v36 = vrot.slane %v407_v34, 2  ;;  %v422_v37 = vadd.f32 %v421_v35, %v420_v33 }
 0x16a   : > { %v409_v38 = vadd.f32 %v408_v36, %v407_v34  ;;  %v423_v39 = vrot.slane %v422_v37, 2 }
 0x16c   : > { %v410_v40 = vrot.slane %v409_v38, 1  ;;  %v424_v41 = vadd.f32 %v423_v39, %v422_v37 }
 0x16e   : > { %v411_v42 = vadd.f32 %v410_v40, %v409_v38  ;;  %v425_v43 = vrot.slane %v424_v41, 1 }
 0x170   : > { %v413_v44 = vmul.f32 0.03125, %v411_v42  ;;  %v426_v45 = vadd.f32 %v425_v43, %v424_v41 }
 0x172   : > { %v427_v46 = vmul.f32 0.03125, %v426_v45  ;;  %v428_v47 = vmul.f32 %v413_v44, %v413_v44 }
 0x174   : > { %v429_v48 = vsub.f32 %v427_v46, %v428_v47 }
 0x176   : > { %v430_v49 = vmax.f32 %v429_v48, 0.0 }
 0x178   : > { %v432_v50 = vadd.f32 1e-05, %v430_v49 }
 0x17a   : > { %938 = vrsqrt.f32 %v432_v50 }
 0x184   : > { %v939_v55 = vpop.eup %938 }
 0x185   : > { %v434_v56 = vmul.f32 %v939_v55, %v431_v53 }
 0x187   : > { %v436_v58 = vmul.f32 %v434_v56, %v413_v44  ;;  %v441_v59 = vrot.slane %v434_v56, %v1358_v54 }
 0x189   : > { %v437_v60 = vsub.f32 %v435_v57, %v436_v58  ;;  %v443_v61 = vmul.f32 %v441_v59, %v391_v22  ;;  %v444_v62 = vmul.f32 %v835_v19, %v441_v59  ;;  %v445_v63 = vmul.f32 %v836_v21, %v441_v59 }
 0x18a   : > { %v442_v0 = vmul.f32 %v441_v59, %v388_v20 }
 0x18b   : > { %v449_v1 = vrot.slane %v437_v60, %v1358_v54 }
 0x18d   : > { %v451_v2 = vadd.f32 %v449_v1, %v443_v61  ;;  %v450_v3 = vadd.f32 %v449_v1, %v442_v0  ;;  %v452_v4 = vadd.f32 %v449_v1, %v444_v62  ;;  %v453_v5 = vadd.f32 %v449_v1, %v445_v63 }
 0x18f   : > { %v792_v6 = vmul.f32 -1.442695, %v451_v2  ;;  %v791_v7 = vmul.f32 -1.442695, %v450_v3  ;;  %v793_v8 = vmul.f32 -1.442695, %v452_v4 }
 0x190   : > { %v794_v9 = vmul.f32 -1.442695, %v453_v5  ;;  %v640_v5 = vld [vmem:[%s1412_s4] sm:$0x1] (!%p803_p6) }
 0x191   : > { %940 = vpow2.f32 %v792_v6 }
 0x192   : > { %942 = vpow2.f32 %v791_v7 }
 0x193   : > { %944 = vpow2.f32 %v793_v8  ;;  %v644_v8 = vld [vmem:[%s1412_s4 + $0x1] sm:$0x1] (!%p803_p6) }
 0x194   : > { %946 = vpow2.f32 %v794_v9 }
 0x19b   : > { %v941_v10 = vpop.eup %940 }
 0x19c   : > { %v943_v11 = vpop.eup %942  ;;  %v467_v12 = vadd.f32 1.0, %v941_v10 }
 0x19d   : > { %v945_v13 = vpop.eup %944  ;;  %v466_v14 = vadd.f32 1.0, %v943_v11 }
 0x19e   : > { %v947_v15 = vpop.eup %946  ;;  %948 = vrcp.f32 %v467_v12  ;;  %v468_v16 = vadd.f32 1.0, %v945_v13 }
 0x19f   : > { %950 = vrcp.f32 %v466_v14  ;;  %v469_v17 = vadd.f32 1.0, %v947_v15 }
 0x1a0   : > { %952 = vrcp.f32 %v468_v16 }
 0x1a1   : > { %954 = vrcp.f32 %v469_v17 }
 0x1a8   : > { %v949_v18 = vpop.eup %948 }
 0x1a9   : > { %v951_v19 = vpop.eup %950 }
 0x1aa   : > { %v953_v20 = vpop.eup %952  ;;  %v482_v21 = vpack.c.bf16 %v949_v18, %v951_v19 }
 0x1ab   : > { %v955_v22 = vpop.eup %954 }
 0x1ac   : > { %853 = vmatprep.mubr.bf16.mxu1 %v482_v21  ;;  %v483_v23 = vpack.c.bf16 %v955_v22, %v953_v20 }
 0x1ae   : > { %854 = vmatmul.mubr.bf16.vlgmr.msra.gmra.mrb[0].mxu1 %v483_v23 }
 0x281   : > { %v855_v26 = vpop.f32.mrb[0].mxu1  ;;  %608 = sbr.rel (%p803_p6) target bundleno = 706 (0x2c2), region = 60 }
 0x282   : > { %v599_v28 = vadd.f32 %v855_v26, %v480_v24  ;;  %v582_v29 = vpop.f32.mrb[1].mxu1 }
 0x283   : > { %v597_v31 = vadd.f32 %v582_v29, %v478_v25  ;;  %v856_v32 = vpop.f32.mrb[2].mxu1 }
 0x284   : > { %603 = vst [vmem:[#allocation2 + $0x10] sm:$0xff] %v599_v28  ;;  %v600_v33 = vadd.f32 %v856_v32, %v481_v27  ;;  %v585_v34 = vpop.f32.mrb[3].mxu1 }
 0x285   : > { %601 = vst [vmem:[#allocation2] sm:$0xff] %v597_v31  ;;  %v598_v35 = vadd.f32 %v585_v34, %v479_v30 }
 0x286   : > { %604 = vst [vmem:[#allocation2 + $0x18] sm:$0xff] %v600_v33 }
 0x287   : > { %602 = vst [vmem:[#allocation2 + $0x8] sm:$0xff] %v598_v35 }
 0x28b   : > { %v611_v38 = vld [vmem:[#allocation2 + $0x10] sm:$0xff] }
 0x28c   : > { %v609_v36 = vld [vmem:[#allocation2] sm:$0xff]  ;;  %v625_v43 = vmul.f32 %v611_v38, %v611_v38 }
 0x28d   : > { %v612_v39 = vld [vmem:[#allocation2 + $0x18] sm:$0xff]  ;;  %v623_v41 = vmul.f32 %v609_v36, %v609_v36 }
 0x28e   : > { %v610_v37 = vld [vmem:[#allocation2 + $0x8] sm:$0xff]  ;;  %v626_v45 = vmul.f32 %v612_v39, %v612_v39 }
 0x28f   : > { %v613_v40 = vadd.f32 %v610_v37, %v609_v36  ;;  %v624_v42 = vmul.f32 %v610_v37, %v610_v37 }
 0x291   : > { %v614_v44 = vadd.f32 %v613_v40, %v611_v38  ;;  %v627_v46 = vadd.f32 %v624_v42, %v623_v41 }
 0x293   : > { %v615_v47 = vadd.f32 %v614_v44, %v612_v39  ;;  %v628_v48 = vadd.f32 %v627_v46, %v625_v43 }
 0x295   : > { %v616_v49 = vrot.slane %v615_v47, 4  ;;  %v629_v50 = vadd.f32 %v628_v48, %v626_v45 }
 0x297   : > { %v617_v51 = vadd.f32 %v616_v49, %v615_v47  ;;  %v630_v52 = vrot.slane %v629_v50, 4 }
 0x299   : > { %v618_v53 = vrot.slane %v617_v51, 2  ;;  %v631_v55 = vadd.f32 %v630_v52, %v629_v50 }
 0x29b   : > { %v619_v56 = vadd.f32 %v618_v53, %v617_v51  ;;  %v632_v57 = vrot.slane %v631_v55, 2 }
 0x29d   : > { %v620_v58 = vrot.slane %v619_v56, 1  ;;  %v633_v59 = vadd.f32 %v632_v57, %v631_v55 }
 0x29f   : > { %v621_v60 = vadd.f32 %v620_v58, %v619_v56  ;;  %v634_v61 = vrot.slane %v633_v59, 1 }
 0x2a1   : > { %v622_v62 = vmul.f32 0.03125, %v621_v60  ;;  %v635_v63 = vadd.f32 %v634_v61, %v633_v59 }
 0x2a3   : > { %v636_v0 = vmul.f32 0.03125, %v635_v63  ;;  %v637_v1 = vmul.f32 %v622_v62, %v622_v62 }
 0x2a5   : > { %v638_v2 = vsub.f32 %v636_v0, %v637_v1 }
 0x2a7   : > { %v639_v3 = vmax.f32 %v638_v2, 0.0 }
 0x2a9   : > { %v641_v4 = vadd.f32 1e-05, %v639_v3 }
 0x2ab   : > { %956 = vrsqrt.f32 %v641_v4 }
 0x2b5   : > { %v957_v6 = vpop.eup %956 }
 0x2b6   : > { %v643_v7 = vmul.f32 %v957_v6, %v640_v5 }
 0x2b8   : > { %v645_v9 = vmul.f32 %v643_v7, %v622_v62  ;;  %v650_v10 = vrot.slane %v643_v7, %v1358_v54 }
 0x2ba   : > { %v646_v11 = vsub.f32 %v644_v8, %v645_v9  ;;  %v651_v12 = vmul.f32 %v650_v10, %v609_v36  ;;  %v652_v13 = vmul.f32 %v650_v10, %v610_v37  ;;  %v653_v14 = vmul.f32 %v650_v10, %v611_v38 }
 0x2bb   : > { %v654_v15 = vmul.f32 %v650_v10, %v612_v39 }
 0x2bc   : > { %v658_v16 = vrot.slane %v646_v11, %v1358_v54 }
 0x2be   : > { %v659_v17 = vadd.f32 %v658_v16, %v651_v12  ;;  %v660_v18 = vadd.f32 %v658_v16, %v652_v13  ;;  %v661_v19 = vadd.f32 %v658_v16, %v653_v14  ;;  %v662_v20 = vadd.f32 %v658_v16, %v654_v15 }
 0x2c0   : > { %663 = vst [vmem:[#allocation9] sm:$0xff] %v659_v17  ;;  %664 = vst [vmem:[#allocation9 + $0x8] sm:$0xff] %v660_v18 }
 0x2c1   : > { %665 = vst [vmem:[#allocation9 + $0x10] sm:$0xff] %v661_v19  ;;  %666 = vst [vmem:[#allocation9 + $0x18] sm:$0xff] %v662_v20 }
 0x2c2 PF: > { %p883_p0 = scmp.eq.s32.totalorder %s1238_s8, 1  ;;  %s1124_s9 = smov [#allocation9]  }
 0x2c3   : > { %s673_s17 = sshll.u32 %s1124_s9, 4  ;;  %s674_s17 = int_to_ptr.vmem [resolvable:$true] %s673_s17 }
 0x2c4   : > { %s1046_s18 = scalar_lea.vmem %s674_s17, 512  ;;  %p1053_p5 = scmp.lt.s32.totalorder %s674_s17, %s674_s17 }
 0x2c5   : > { %p1047_p4 = scmp.ne.s32.totalorder %s674_s17, %s1046_s18  ;;  %p1054_p3 = scmp.lt.s32.totalorder %s1046_s18, %s1046_s18 }
 0x2c7   : > { %p1048_p2 = pnand %p1047_p4, %p883_p0  ;;  %p1055_p8 = por %p1054_p3, %p1053_p5 }
 0x2c9   : > { %p1049_p12 = pneg %p1048_p2 }
 0x2cb   : > { %p1056_p1 = pnand %p1055_p8, %p1049_p12 }
 0x2cd   : > { %1059 = shalt.err (!%p1056_p1)
}
 0x2ce   : > { %s1060_s14 = scalar_lea.hbm %s1413_s5, 512 }
 0x2cf   : > { %p1061_p10 = scmp.ne.s32.totalorder %s1413_s5, %s1060_s14  ;;  %p1066_p7 = scmp.lt.u32.totalorder %s1060_s14, %s1413_s5 }
 0x2d1   : > { %p1062_p11 = pnand %p1061_p10, %p883_p0 }
 0x2d3   : > { %p1063_p9 = pneg %p1062_p11 }
 0x2d5   : > { %p1068_p13 = pnand %p1066_p7, %p1063_p9 }
 0x2d7   : > { %1071 = shalt.err (!%p1068_p13)
}
 0x2d8   : > { %s1125_s6 = smov 128   ;;  %s1126_s13 = smov 8  }
 0x2d9   : > { %866 = dma.vmem_to_hbm [thread:$0]  (%p883_p0), %s674_s17, 512, %s1413_s5, [#allocation5], %s1125_s6, %s1125_s6, %s1126_s13  }
 0x2da   : > { %1097 = dma.done.wait (%p883_p0), [#allocation5], 512  }
 0x2db   : > { %1099 = vsyncadd (%p883_p0), [#allocation5], 4294966784 }
 0x2dc PF: > { %p17_p6 = scmp.ge.s32.totalorder %s1178_s22, 4   ;;  %s1434_s18 = smov %s1106_s19 }
 0x2dd   : > { %s1435_s19 = smov %s1110_s20  ;;  %s1436_s20 = smov %s1187_s25 }
 0x2de   : > { %s1437_s21 = smov %s1178_s22  ;;  %19 = sbr.rel (!%p17_p6) target bundleno = 5 (0x5), region = 104 }
 0x2e5   :  { %689 = vsyncpa [#allocation4], 1 }
 0x2e6   :  { %691 = vsyncpa [#allocation4 + $0x1], 1 }
 0x2e7   :  { %692 = vsyncpa [#allocation7], 1 }
 0x2e8   :  { %694 = vsyncpa [#allocation7 + $0x1], 1 }
 0x2e9   :  { %695 = vsyncpa [#allocation5], 1 }
 0x2ea   :  { %697 = vsyncpa [#allocation5 + $0x1], 1 }

</bundles_post_ra>
